<compile_context>
chip_gen: v7x
topology: tpu7x:2x2x1
jax: 0.10.0
libtpu: 0.0.40
codegen_flags: <defaults>
</compile_context>

<pallas_src>
import functools

import jax
import jax.numpy as jnp
from jax.experimental import pallas as pl
from jax.experimental.pallas import tpu as pltpu


def _round_up(v, m):
    return -(-v // m) * m


def _layernorm_kernel(x_ref, gamma_ref, beta_ref, o_ref, *, eps, hidden):
    # x_ref: (tile_rows, hidden); gamma_ref/beta_ref: (1, hidden) float32.
    inv_h = jnp.float32(1.0 / hidden)

    # Pass 1: mean (XLU cross-lane reduce; free-ish under the HBM roofline).
    x = x_ref[...].astype(jnp.float32)
    mean = jnp.sum(x, axis=-1, keepdims=True) * inv_h

    # Pass 2: centered values + biased variance. Two-pass form matches
    # torch.std(unbiased=False) numerics much better than s2/h - mean^2.
    xc = x - mean                      # `x` is dead after this point
    var = jnp.sum(xc * xc, axis=-1, keepdims=True) * inv_h
    std = jnp.sqrt(var)

    # eps is added to the *std* (not the variance) to match the PyTorch module.
    # Per-row reciprocal (tile_rows, 1) on the EUP instead of a per-element divide.
    inv = pl.reciprocal(std + eps, approx=False)

    o_ref[...] = (gamma_ref[...] * (xc * inv) + beta_ref[...]).astype(o_ref.dtype)


def manual_layer_norm(x, gamma, beta, eps=1e-5):
    """Pallas implementation of ManualLayerNorm over the last axis of x."""
    orig_shape = x.shape
    hidden = orig_shape[-1]
    assert gamma.shape == (hidden,) and beta.shape == (hidden,)

    rows = 1
    for d in orig_shape[:-1]:
        rows *= d
    x2 = x.reshape(rows, hidden)

    # gamma/beta are tiny; pre-cast once in the wrapper (loop-invariant blocks).
    gamma2 = gamma.astype(jnp.float32).reshape(1, hidden)
    beta2 = beta.astype(jnp.float32).reshape(1, hidden)

    # ---- VMEM-aware tile sizing ----
    itemsize = jnp.dtype(x.dtype).itemsize
    sub_mult = {4: 8, 2: 16, 1: 32}.get(itemsize, 8)  # rows per sublane pack

    try:
        vmem_cap = int(pltpu.get_tpu_info().vmem_capacity_bytes)
    except Exception:
        vmem_cap = 64 * 1024 * 1024                    # conservative (v7x-sized)
    vmem_limit = int(min(100 * 1024 * 1024, (vmem_cap * 3) // 4))

    # Per-row VMEM footprint: double-buffered in/out blocks (native dtype) plus
    # ~2 block-sized f32 temporaries inside the kernel body.
    bytes_per_row = hidden * (4 * itemsize + 8)
    if sub_mult * bytes_per_row > vmem_limit:
        # TODO(synk): very wide rows need a lane-split two-pass reduction path.
        raise NotImplementedError(
            f"hidden={hidden} is too wide for the single-block-per-row LayerNorm "
            f"within {vmem_limit} bytes of VMEM")

    # Block-size target: bigger blocks on 128 MiB-VMEM parts (v5e/v6e), ~4 MiB
    # on 64 MiB-VMEM parts (v7x).
    if vmem_cap >= 100 * 1024 * 1024:
        target_block_bytes = min(16 * 1024 * 1024, vmem_limit // 8)
    else:
        target_block_bytes = min(4 * 1024 * 1024, vmem_limit // 12)

    tile_rows = max(
        sub_mult,
        (target_block_bytes // (hidden * itemsize)) // sub_mult * sub_mult)
    # Hard cap: whole pipelined working set must fit under vmem_limit.
    tile_rows = min(
        tile_rows,
        max(sub_mult, (vmem_limit // bytes_per_row) // sub_mult * sub_mult))

    # Keep the grid deep enough to pipeline: >= ~8 steps (>= 4 per v7x
    # TensorCore, and enough prefetch/writeback overlap on single-TC chips)
    # when rows allow; otherwise at least 2 steps when possible.
    target_grid = 8
    if rows >= target_grid * sub_mult:
        tile_rows = min(
            tile_rows,
            max(sub_mult, (rows // target_grid) // sub_mult * sub_mult))
    elif rows > sub_mult:
        tile_rows = min(tile_rows, _round_up(pl.cdiv(rows, 2), sub_mult))
    tile_rows = min(tile_rows, _round_up(rows, sub_mult))

    # Uneven last block is handled by Pallas (reads padded, stores masked);
    # rows are independent so padding rows never leak into valid output.
    grid = (pl.cdiv(rows, tile_rows),)

    out = pl.pallas_call(
        functools.partial(_layernorm_kernel, eps=eps, hidden=hidden),
        out_shape=jax.ShapeDtypeStruct((rows, hidden), x.dtype),
        grid_spec=pltpu.PrefetchScalarGridSpec(
            num_scalar_prefetch=0,
            grid=grid,
            in_specs=[
                # Last block dim == full array dim (`hidden`), so no lane padding
                # of x is needed even when hidden % 128 != 0.
                pl.BlockSpec((tile_rows, hidden), lambda i: (i, 0)),
                pl.BlockSpec((1, hidden), lambda i: (0, 0)),
                pl.BlockSpec((1, hidden), lambda i: (0, 0)),
            ],
            out_specs=pl.BlockSpec((tile_rows, hidden), lambda i: (i, 0)),
        ),
        compiler_params=pltpu.CompilerParams(
            dimension_semantics=("parallel",),
            vmem_limit_bytes=vmem_limit,
        ),
    )(x2, gamma2, beta2)

    return out.reshape(orig_shape)


def _reference_layer_norm(x, gamma, beta, eps=1e-5):
    x32 = x.astype(jnp.float32)
    mean = jnp.mean(x32, axis=-1, keepdims=True)
    std = jnp.sqrt(jnp.mean((x32 - mean) ** 2, axis=-1, keepdims=True))
    return (gamma * ((x32 - mean) / (std + eps)) + beta).astype(x.dtype)


if __name__ == "__main__":
    # Deterministic params, matching nn.Parameter(torch.ones/zeros(normalized_shape))
    batch, seq, hidden = 2, 8, 32
    gamma = jnp.ones((hidden,), dtype=jnp.float32)
    beta = jnp.zeros((hidden,), dtype=jnp.float32)

    key = jax.random.PRNGKey(0)
    x = jax.random.normal(key, (batch, seq, hidden), dtype=jnp.float32)

    out = manual_layer_norm(x, gamma, beta, eps=1e-5)
    out = jax.block_until_ready(out)

    ref = _reference_layer_norm(x, gamma, beta, eps=1e-5)
    assert out.shape == x.shape
    assert jnp.allclose(out, ref, atol=1e-4, rtol=1e-4), "mismatch vs reference"

    print("KERNEL_OK")
</pallas_src>

<mosaic_0001>
module attributes {stable_mosaic.version = 11 : i64} {
  func.func @_layernorm_kernel(%arg0: i32, %arg1: memref<8x32xf32, #tpu.memory_space<vmem>>, %arg2: memref<1x32xf32, #tpu.memory_space<vmem>>, %arg3: memref<1x32xf32, #tpu.memory_space<vmem>>, %arg4: memref<8x32xf32, #tpu.memory_space<vmem>>) attributes {dimension_semantics = [#tpu.dimension_semantics<parallel>], iteration_bounds = array<i64: 2>, scalar_prefetch = 0 : i64, scratch_operands = 0 : i64, tpu.core_type = #tpu.core_type<tc>, window_params = [{transform_indices = @transform_0, window_bounds = array<i64: 8, 32>}, {pipeline_mode = #tpu.pipeline_mode<synchronous>, transform_indices = @transform_1, window_bounds = array<i64: 1, 32>}, {pipeline_mode = #tpu.pipeline_mode<synchronous>, transform_indices = @transform_2, window_bounds = array<i64: 1, 32>}, {transform_indices = @transform_3, window_bounds = array<i64: 8, 32>}]} {
    %c0 = arith.constant 0 : index
    %c0_0 = arith.constant 0 : index
    %0 = vector.load %arg1[%c0, %c0_0] : memref<8x32xf32, #tpu.memory_space<vmem>>, vector<8x32xf32>
    %cst = arith.constant dense<0.000000e+00> : vector<8xf32>
    %1 = vector.multi_reduction <add>, %0, %cst [1] : vector<8x32xf32> to vector<8xf32>
    %2 = vector.shape_cast %1 : vector<8xf32> to vector<8x1xf32>
    %cst_1 = arith.constant 3.125000e-02 : f32
    %3 = vector.broadcast %cst_1 : f32 to vector<8x1xf32>
    %4 = arith.mulf %2, %3 : vector<8x1xf32>
    %5 = vector.broadcast %4 : vector<8x1xf32> to vector<8x32xf32>
    %6 = arith.subf %0, %5 : vector<8x32xf32>
    %7 = arith.mulf %6, %6 : vector<8x32xf32>
    %cst_2 = arith.constant dense<0.000000e+00> : vector<8xf32>
    %8 = vector.multi_reduction <add>, %7, %cst_2 [1] : vector<8x32xf32> to vector<8xf32>
    %9 = vector.shape_cast %8 : vector<8xf32> to vector<8x1xf32>
    %cst_3 = arith.constant 3.125000e-02 : f32
    %10 = vector.broadcast %cst_3 : f32 to vector<8x1xf32>
    %11 = arith.mulf %9, %10 : vector<8x1xf32>
    %12 = math.sqrt %11 : vector<8x1xf32>
    %cst_4 = arith.constant 9.99999974E-6 : f32
    %13 = vector.broadcast %cst_4 : f32 to vector<8x1xf32>
    %14 = arith.addf %12, %13 : vector<8x1xf32>
    %15 = tpu.reciprocal %14 : vector<8x1xf32> -> vector<8x1xf32>
    %c0_5 = arith.constant 0 : index
    %c0_6 = arith.constant 0 : index
    %16 = vector.load %arg2[%c0_5, %c0_6] : memref<1x32xf32, #tpu.memory_space<vmem>>, vector<1x32xf32>
    %17 = vector.broadcast %15 : vector<8x1xf32> to vector<8x32xf32>
    %18 = arith.mulf %6, %17 : vector<8x32xf32>
    %19 = vector.broadcast %16 : vector<1x32xf32> to vector<8x32xf32>
    %20 = arith.mulf %19, %18 : vector<8x32xf32>
    %c0_7 = arith.constant 0 : index
    %c0_8 = arith.constant 0 : index
    %21 = vector.load %arg3[%c0_7, %c0_8] : memref<1x32xf32, #tpu.memory_space<vmem>>, vector<1x32xf32>
    %22 = vector.broadcast %21 : vector<1x32xf32> to vector<8x32xf32>
    %23 = arith.addf %20, %22 : vector<8x32xf32>
    %c0_9 = arith.constant 0 : index
    %c0_10 = arith.constant 0 : index
    %24 = vector.load %arg4[%c0_9, %c0_10] : memref<8x32xf32, #tpu.memory_space<vmem>>, vector<8x32xf32>
    tpu.vector_store %arg4[%c0_9, %c0_10], %23 {strides = array<i32>} : memref<8x32xf32, #tpu.memory_space<vmem>>, vector<8x32xf32>,
    return
  }
  func.func @transform_0(%arg0: i32) -> (i32, i32) {
    %c0_i32 = arith.constant 0 : i32
    %c0_i32_0 = arith.constant 0 : i32
    return %arg0, %c0_i32 : i32, i32
  }
  func.func @transform_1(%arg0: i32) -> (i32, i32) {
    %c0_i32 = arith.constant 0 : i32
    %c0_i32_0 = arith.constant 0 : i32
    %c0_i32_1 = arith.constant 0 : i32
    return %c0_i32, %c0_i32_0 : i32, i32
  }
  func.func @transform_2(%arg0: i32) -> (i32, i32) {
    %c0_i32 = arith.constant 0 : i32
    %c0_i32_0 = arith.constant 0 : i32
    %c0_i32_1 = arith.constant 0 : i32
    return %c0_i32, %c0_i32_0 : i32, i32
  }
  func.func @transform_3(%arg0: i32) -> (i32, i32) {
    %c0_i32 = arith.constant 0 : i32
    %c0_i32_0 = arith.constant 0 : i32
    return %arg0, %c0_i32 : i32, i32
  }
}

</mosaic_0001>

<bundles_post_ra>
// kernel: tpu_custom_call.1
= control target key start
LH: loop header
LB: loop body
LE: loop exit
PB: predicated region body
PF: predicated region fallthrough
CT: control target
= control target key end

     0   :  { %8 = vsyncpa [#allocation3], 0  ;;  %s667_s0 = inlined_call_operand.hbm [shape: f32[16,32], index: 0, kind: input, shape index: {}]   ;;  %s668_s1 = inlined_call_operand.vmem [shape: f32[1,32], index: 1, kind: input, shape index: {}]   ;;  %s669_s2 = inlined_call_operand.vmem [shape: f32[1,32], index: 2, kind: input, shape index: {}]   ;;  %s670_s3 = inlined_call_operand.hbm [shape: f32[16,32], index: 3, kind: output, shape index: {}]  }
   0x1   :  { %10 = vsyncpa [#allocation3 + $0x1], 0 }
   0x2   :  { %11 = vsyncpa [#allocation4], 0 }
   0x3   :  { %13 = vsyncpa [#allocation4 + $0x1], 0  ;;  %s493_s12 = smov 0   ;;  %s495_s13 = smov 0  }
   0x4   :  { %s497_s14 = smov 0   ;;  %s499_s15 = smov 0  }
   0x5 LB: > { %s514_s16 = sadd.s32 4294967295, %s469_s15   ;;  %s309_s17 = sadd.s32 4294967294, %s469_s15   ;;  %s469_s15 = sphi %s499_s15, %s685_s15   ;;  %s465_s14 = sphi %s497_s14, %s684_s14   ;;  %s461_s13 = sphi %s495_s13, %s683_s13   ;;  %s457_s12 = sphi %s493_s12, %s682_s12  }
   0x6   : > { %s518_s18 = sadd.s32 1, %s469_s15   ;;  %s26_s19 = sadd.s32 1, %s465_s14 }
   0x7   : > { %s23_s20 = ssub.s32 %s469_s15, %s518_s18  ;;  %p33_p0 = scmp.ne.s32.totalorder %s465_s14, %s461_s13 }
   0x8   : > { %p24_p1 = scmp.eq.s32.totalorder %s23_s20, 0  ;;  %p34_p2 = scmp.eq.s32.totalorder %s469_s15, 0 }
   0x9   : > { %p39_p3 = scmp.ne.s32.totalorder %s461_s13, %s457_s12  ;;  %p40_p4 = scmp.eq.s32.totalorder %s514_s16, 0 }
   0xa   : > { %s530_s21 = scalar_select %p24_p1, %s465_s14, %s26_s19  }
   0xb   : > { %p532_p5 = por %p34_p2, %p33_p0  ;;  %p536_p6 = por %p40_p4, %p39_p3 }
   0xc   : > { %p105_p7 = scmp.eq.s32.totalorder %s514_s16, 1  ;;  %p111_p8 = scmp.eq.s32.totalorder %s309_s17, 1 }
   0xd   : > { %p335_p10 = scmp.lt.s32.totalorder %s469_s15, 2  ;;  %s137_s26 = sand.u32 1, %s465_s14  }
   0xe   : > { %p543_p11 = por %p105_p7, %p33_p0  ;;  %p547_p12 = por %p111_p8, %p39_p3 }
   0xf   : > { %s313_s27 = sshll.u32 %s469_s15, 7  ;;  %s312_s28 = sshll.u32 %s137_s26, 3 }
  0x10   : > { %s674_s24 = scalar_select %p543_p11, 1, 0 }
  0x11   : > { %s675_s25 = scalar_select %p547_p12, 1, 0 }
  0x12   : > { %s556_s4 = scalar_lea.hbm %s667_s0, %s313_s27  ;;  %s141_s5 = scalar_lea.vmem [#allocation2], %s312_s28 }
  0x13   : > { %s148_s6 = sshll.u32 %s141_s5, 4  ;;  %p560_p13 = pnand %p335_p10, %p532_p5  ;;  %s564_s6 = int_to_ptr.vmem [resolvable:$true] %s148_s6 }
  0x14   : > { %s138_s8 = scalar_lea.sflag [#allocation3], %s137_s26  ;;  %s373_s9 = scalar_lea.hbm %s556_s4, 128 }
  0x15   : > { %p374_p2 = scmp.ne.s32.totalorder %s556_s4, %s373_s9  ;;  %p375_p3 = pneg %p560_p13 }
  0x16   : > { %s378_s17 = scalar_lea.hbm %s667_s0, 256  ;;  %p379_p5 = scmp.lt.u32.totalorder %s556_s4, %s667_s0 }
  0x17   : > { %p376_p4 = pnand %p375_p3, %p374_p2  ;;  %p380_p8 = scmp.lt.u32.totalorder %s378_s17, %s373_s9 }
  0x18   : > { %p382_p9 = scmp.lt.u32.totalorder %s373_s9, %s556_s4 }
  0x19   : > { %p377_p7 = pneg %p376_p4  ;;  %p381_p10 = por %p380_p8, %p379_p5 }
  0x1b   : > { %p383_p0 = por %p382_p9, %p381_p10 }
  0x1d   : > { %p384_p1 = pnand %p383_p0, %p377_p7 }
  0x1f   : > { %387 = shalt.err (!%p384_p1)
}
  0x20   : > { %s388_s22 = scalar_lea.vmem %s564_s6, 128  ;;  %s471_s26 = smov [#allocation2]  }
  0x21   : > { %p389_p2 = scmp.ne.s32.totalorder %s564_s6, %s388_s22  ;;  %s393_s27 = sshll.u32 %s471_s26, 4  ;;  %s394_s27 = int_to_ptr.vmem [resolvable:$false] %s393_s27 }
  0x22   : > { %s395_s28 = scalar_lea.vmem %s394_s27, 256  ;;  %p396_p11 = scmp.lt.s32.totalorder %s564_s6, %s394_s27 }
  0x23   : > { %p391_p4 = pnand %p389_p2, %p375_p3  ;;  %p397_p5 = scmp.lt.s32.totalorder %s395_s28, %s388_s22 }
  0x25   : > { %p392_p12 = pneg %p391_p4  ;;  %p398_p8 = por %p397_p5, %p396_p11 }
  0x27   : > { %p399_p9 = pnand %p398_p8, %p392_p12 }
  0x29   : > { %402 = shalt.err (!%p399_p9)
}
  0x2a   : > { %330 = dma.hbm_to_vmem [thread:$0]  (!%p560_p13), %s556_s4, 128, %s564_s6, %s138_s8  }
  0x2b   : > { %p677_p0 = scmp.lt.s32.totalorder %s469_s15, 3  ;;  %p678_p1 = scmp.ge.s32.totalorder %s469_s15, 1 }
  0x2d   : > { %p154_p3 = pnand %p678_p1, %p677_p0 }
  0x2e   : > { %s598_s29 = sand.u32 (!%p154_p3), 1, %s461_s13  }
  0x2f   : > { %157 = sbr.rel (%p154_p3) target bundleno = 398 (0x18e), region = 32  ;;  %s315_s30 = sshll.u32 (!%p154_p3), %s598_s29, 3 }
  0x30   : > { %s160_s5 = scalar_lea.sflag (!%p154_p3), [#allocation3], %s598_s29  ;;  %s163_s7 = scalar_lea.vmem (!%p154_p3), [#allocation2], %s315_s30 }
  0x36   : > { %448 = dma.done.wait (%p536_p6), %s160_s5, 128  }
  0x37   : > { %450 = vsyncadd (%p536_p6), %s160_s5, 4294967168  ;;  %vm187_vm0 = vcmask 261120   ;;  %v186_v0 = vld [vmem:[%s163_s7] sm:$0xff]  ;;  %s320_s9 = sshll.u32 %s514_s16, 7  ;;  %s185_s10 = scalar_lea.vmem [#allocation5], %s315_s30 }
  0x38   : > { %v188_v1 = vsel %vm187_vm0, %v186_v0, 0.0  ;;  %v317_v16 = vld [vmem:[%s668_s1] ss:$0 sm:$0xff]  ;;  %s239_s11 = sshll.u32 %s185_s10, 4  ;;  %s622_s20 = scalar_lea.hbm %s670_s3, %s320_s9  ;;  %s624_s11 = int_to_ptr.vmem [resolvable:$true] %s239_s11 }
  0x39   : > { %189 = vadd.xlane.f32.xlu0 %v188_v1  ;;  %v318_v18 = vld [vmem:[%s669_s2] ss:$0 sm:$0xff]  ;;  %s226_s22 = scalar_lea.sflag [#allocation4], %s598_s29  ;;  %s403_s26 = scalar_lea.vmem %s624_s11, 128 }
  0x3a   : > { %p404_p6 = scmp.ne.s32.totalorder %s624_s11, %s403_s26  ;;  %p679_p11 = scmp.ne.s32.totalorder %s674_s24, 0 }
  0x3b   : > { %s472_s16 = smov [#allocation5]  }
  0x3c   : > { %p405_p12 = pnand %p404_p6, %p679_p11  ;;  %s407_s27 = sshll.u32 %s472_s16, 4  ;;  %s408_s27 = int_to_ptr.vmem [resolvable:$false] %s407_s27 }
  0x3d   : > { %s409_s28 = scalar_lea.vmem %s408_s27, 256  ;;  %p410_p7 = scmp.lt.s32.totalorder %s624_s11, %s408_s27 }
  0x3e   : > { %p406_p13 = pneg %p405_p12  ;;  %p411_p10 = scmp.lt.s32.totalorder %s409_s28, %s403_s26 }
  0x40   : > { %p412_p2 = por %p411_p10, %p410_p7 }
  0x42   : > { %p413_p4 = pnand %p412_p2, %p406_p13 }
  0xc6   : > { %v190_v2 = vpop.xlane.xlu0 %189 }
  0xc7   : > { %v191_v3 = vmul.f32 0.03125, %v190_v2 }
  0xc9   : > { %v192_v4 = vsub.f32 %v186_v0, %v191_v3 }
  0xcb   : > { %v193_v5 = vmul.f32 %v192_v4, %v192_v4 }
  0xcd   : > { %v194_v6 = vsel %vm187_vm0, %v193_v5, 0.0 }
  0xce   : > { %195 = vadd.xlane.f32.xlu0 %v194_v6 }
 0x15b   : > { %v196_v7 = vpop.xlane.xlu0 %195 }
 0x15c   : > { %v197_v8 = vmul.f32 0.03125, %v196_v7 }
 0x15e   : > { %369 = vrsqrt.f32 %v197_v8  ;;  %vm200_vm1 = vcmp.eq.f32.partialorder %v197_v8, inf  ;;  %v203_v11 = vand.u32 2147483648, %v197_v8  ;;  %vm202_vm2 = vcmp.eq.f32.partialorder %v197_v8, 0.0 }
 0x168   : > { %v370_v9 = vpop.eup %369 }
 0x169   : > { %v199_v10 = vmul.f32 %v370_v9, %v197_v8 }
 0x16b   : > { %v201_v12 = vsel %vm200_vm1, %v197_v8, %v199_v10 }
 0x16c   : > { %v204_v13 = vsel %vm202_vm2, %v203_v11, %v201_v12 }
 0x16d   : > { %v205_v14 = vadd.f32 1e-05, %v204_v13 }
 0x16f   : > { %371 = vrcp.f32 %v205_v14 }
 0x179   : > { %v372_v15 = vpop.eup %371 }
 0x17a   : > { %v208_v17 = vmul.f32 %v372_v15, %v192_v4 }
 0x17c   : > { %v215_v19 = vmul.f32 %v317_v16, %v208_v17 }
 0x17e   : > { %v223_v20 = vadd.f32 %v318_v18, %v215_v19 }
 0x180   : > { %224 = vst.msk [vmem:[%s185_s10] sm:$0xff] %vm187_vm0, %v223_v20 }
 0x181   : > { %416 = shalt.err (!%p413_p4)
}
 0x182   : > { %s417_s29 = scalar_lea.hbm %s622_s20, 128  ;;  %s421_s7 = scalar_lea.hbm %s670_s3, 256 }
 0x183   : > { %p418_p5 = scmp.ne.s32.totalorder %s622_s20, %s417_s29  ;;  %p422_p0 = scmp.lt.u32.totalorder %s622_s20, %s670_s3 }
 0x184   : > { %p423_p1 = scmp.lt.u32.totalorder %s421_s7, %s417_s29  ;;  %p425_p6 = scmp.lt.u32.totalorder %s417_s29, %s622_s20 }
 0x185   : > { %p419_p8 = pnand %p418_p5, %p679_p11 }
 0x186   : > { %p424_p3 = por %p423_p1, %p422_p0 }
 0x187   : > { %p420_p9 = pneg %p419_p8 }
 0x188   : > { %p426_p12 = por %p425_p6, %p424_p3 }
 0x18a   : > { %p427_p13 = pnand %p426_p12, %p420_p9 }
 0x18c   : > { %430 = shalt.err (!%p427_p13)
}
 0x18d   : > { %325 = dma.vmem_to_hbm [thread:$0]  (%p679_p11), %s624_s11, 128, %s622_s20, %s226_s22  }
 0x18e PF: > { %s251_s6 = sand.u32 1, %s457_s12   ;;  %p680_p7 = scmp.ne.s32.totalorder %s675_s25, 0 }
 0x18f   : > { %p681_p10 = scmp.ge.s32.totalorder %s469_s15, 2  ;;  %s252_s8 = scalar_lea.sflag [#allocation4], %s251_s6 }
 0x191   : > { %p332_p2 = pnand %p681_p10, %p680_p7 }
 0x193   : > { %452 = dma.done.wait (!%p332_p2), %s252_s8, 128  }
 0x194   : > { %454 = vsyncadd (!%p332_p2), %s252_s8, 4294967168  ;;  %p16_p4 = scmp.ge.s32.totalorder %s518_s18, 4   ;;  %s682_s12 = smov %s461_s13 }
 0x195   : > { %s683_s13 = smov %s465_s14  ;;  %s684_s14 = smov %s530_s21 }
 0x196   : > { %s685_s15 = smov %s518_s18  ;;  %18 = sbr.rel (!%p16_p4) target bundleno = 5 (0x5), region = 77 }
 0x19d   :  { %257 = vsyncpa [#allocation3], 1 }
 0x19e   :  { %259 = vsyncpa [#allocation3 + $0x1], 1 }
 0x19f   :  { %260 = vsyncpa [#allocation4], 1 }
 0x1a0   :  { %262 = vsyncpa [#allocation4 + $0x1], 1 }

</bundles_post_ra>
